<compile_context>
chip_gen: v6e
topology: v6e:2x2x1
jax: 0.10.0
libtpu: 0.0.40
codegen_flags: <defaults>
</compile_context>

<pallas_src>
import functools

import jax
import jax.numpy as jnp
from jax import lax
from jax.experimental import pallas as pl
from jax.experimental.pallas import tpu as pltpu


def stgs_kernel(temp_ref, x_ref, u1_ref, u2_ref, *out_refs, stgs_hard, eps):
    ids_ref = out_refs[0]
    if stgs_hard:
        onehot_ref, ysoft_ref = out_refs[1], out_refs[2]
    else:
        ysoft_ref = out_refs[1]

    TM, V = x_ref.shape
    x = x_ref[...].astype(jnp.float32)
    temp = temp_ref[0]

    # u = rand * (0.999 - eps) + eps ; gumbels = -log(-log(u))
    u1 = u1_ref[...] * (0.999 - eps) + eps
    g1 = -jnp.log(-jnp.log(u1))

    # softmax((x + g) / temperature, axis=-1)
    z = (x + g1) / temp
    m = jnp.max(z, axis=-1, keepdims=True)
    e = jnp.exp(z - m)
    s = jnp.sum(e, axis=-1, keepdims=True)
    y_soft = e / s

    # Categorical(probs=y_soft).sample() via the Gumbel-max trick:
    #   argmax_j(log y_soft_j + g2_j) == argmax_j(z_j + g2_j)
    # (per-row constants m and log-sum-exp drop out of the argmax).
    u2 = u2_ref[...] * (0.999 - eps) + eps
    g2 = -jnp.log(-jnp.log(u2))
    zz = z + g2
    mm = jnp.max(zz, axis=-1, keepdims=True)
    col = lax.broadcasted_iota(jnp.int32, (TM, V), 1)
    # first index attaining the max (ties have probability ~0)
    idx = jnp.min(jnp.where(zz == mm, col, V), axis=-1, keepdims=True)

    # one-hot of the sampled index (int compare, exact)
    y_hard = (col == idx).astype(jnp.float32)

    if stgs_hard:
        # y_hard - y_soft.detach() + y_soft  (forward value)
        out_onehot = y_hard - y_soft + y_soft
    else:
        out_onehot = y_soft

    # gather(output_one_hot, -1, output_ids)
    gathered = jnp.sum(out_onehot * y_hard, axis=-1, keepdims=True)
    # output_ids.detach() - gathered.detach() + gathered  (forward value)
    diff_ids = idx.astype(jnp.float32) - gathered + gathered

    # lane-dense store of the per-row sampled id (value broadcast over 128 lanes)
    ids_ref[...] = jnp.broadcast_to(diff_ids, ids_ref.shape)
    if stgs_hard:
        onehot_ref[...] = out_onehot
    ysoft_ref[...] = y_soft


def _choose_block_rows(R, V, requested=None):
    """Largest row-tile (<=1024) dividing R that fits a conservative VMEM budget."""
    if requested is not None:
        assert R % requested == 0, "block_rows must divide batch*seq"
        return requested
    # ~3 input slabs + up to 2 output slabs, double-buffered => ~10 live slabs.
    budget_bytes = 20 * 1024 * 1024
    bytes_per_row = 10 * V * 4
    cap = max(8, budget_bytes // max(bytes_per_row, 1))
    for cand in (1024, 512, 256, 128, 64, 32, 16, 8):
        if cand <= cap and R % cand == 0:
            return cand
    return R  # tiny / oddly-sized inputs: single tile


def stgs_forward(x, temperature=None, *, init_temperature=1.0,
                 stgs_hard=False, eps=1e-12, seed=0, block_rows=None):
    """Returns (diff_output_ids, output_one_hot, eff_temperature, y_soft)."""
    B, S, V = x.shape
    R = B * S
    br = _choose_block_rows(R, V, block_rows)
    num_tiles = R // br

    # TODO(synk): learnable / hidden-state-conditioned temperature (nn.Parameter,
    # tau_fc Linear+Softplus on hidden_states) not implemented; fixed scalar only.
    eff_temp = jnp.array(
        [temperature if temperature is not None else init_temperature],
        dtype=jnp.float32)

    # Deterministic noise (jax.random) streamed into the kernel; the gumbel
    # transform itself runs in-kernel.  (In-kernel pltpu PRNG has no
    # CPU/interpret lowering, so it is avoided for portability.)
    key = jax.random.PRNGKey(seed)
    k1, k2 = jax.random.split(key)
    u1 = jax.random.uniform(k1, (R, V), dtype=jnp.float32)   # softmax perturbation
    u2 = jax.random.uniform(k2, (R, V), dtype=jnp.float32)   # sampling draw

    xr = x.reshape(R, V).astype(jnp.float32)

    kernel = functools.partial(stgs_kernel, stgs_hard=stgs_hard, eps=eps)

    slab_spec = pl.BlockSpec((br, V), lambda i: (i, 0))
    out_shapes = [jax.ShapeDtypeStruct((R, 128), jnp.float32)]       # ids, lane-dense
    out_specs = [pl.BlockSpec((br, 128), lambda i: (i, 0))]
    if stgs_hard:
        out_shapes.append(jax.ShapeDtypeStruct((R, V), jnp.float32))  # one-hot (ST form)
        out_specs.append(pl.BlockSpec((br, V), lambda i: (i, 0)))
    out_shapes.append(jax.ShapeDtypeStruct((R, V), jnp.float32))      # y_soft
    out_specs.append(pl.BlockSpec((br, V), lambda i: (i, 0)))

    outs = pl.pallas_call(
        kernel,
        out_shape=tuple(out_shapes),
        grid=(num_tiles,),
        in_specs=[
            pl.BlockSpec(memory_space=pltpu.MemorySpace.SMEM),  # temperature scalar
            slab_spec,                                          # logits
            pl.BlockSpec((br, V), lambda i: (i, 0)),            # u1
            pl.BlockSpec((br, V), lambda i: (i, 0)),            # u2
        ],
        out_specs=tuple(out_specs),
        compiler_params=pltpu.CompilerParams(
            dimension_semantics=("parallel",)),
    )(eff_temp, xr, u1, u2)

    ids_lanes = outs[0]
    if stgs_hard:
        onehot, ysoft = outs[1], outs[2]
    else:
        ysoft = outs[1]
        onehot = ysoft  # identical tensors in the soft path -> single HBM write

    diff_ids = ids_lanes[:, 0].reshape(B, S)
    return (diff_ids,
            onehot.reshape(B, S, V),
            eff_temp,
            ysoft.reshape(B, S, V))


if __name__ == "__main__":
    key = jax.random.PRNGKey(0)
    B, S, V = 2, 8, 128                      # batch, seq_len, vocab_size
    x = jax.random.normal(key, (B, S, V), dtype=jnp.float32)

    # hard (straight-through) path
    diff_ids, one_hot, temp, y_soft = stgs_forward(
        x, temperature=1.0, stgs_hard=True, seed=0)
    jax.block_until_ready((diff_ids, one_hot, temp, y_soft))

    assert diff_ids.shape == (B, S)
    assert one_hot.shape == (B, S, V) and y_soft.shape == (B, S, V)
    assert jnp.allclose(jnp.sum(y_soft, axis=-1), 1.0, atol=1e-4)
    ids_int = jnp.round(diff_ids).astype(jnp.int32)
    assert jnp.all((ids_int >= 0) & (ids_int < V))
    assert jnp.allclose(diff_ids, ids_int.astype(jnp.float32), atol=1e-3)
    assert jnp.allclose(jnp.sum(one_hot, axis=-1), 1.0, atol=1e-3)

    # soft path (deduplicated output writeback)
    d2, oh2, t2, ys2 = stgs_forward(x, temperature=0.7, stgs_hard=False, seed=1)
    jax.block_until_ready((d2, oh2, t2, ys2))
    assert jnp.allclose(oh2, ys2)
    assert jnp.allclose(jnp.sum(ys2, axis=-1), 1.0, atol=1e-4)

    print("KERNEL_OK")
</pallas_src>

<mosaic_0001>
module attributes {stable_mosaic.version = 11 : i64} {
  func.func @stgs_kernel(%arg0: i32, %arg1: memref<1xf32, #tpu.memory_space<smem>>, %arg2: memref<16x128xf32, #tpu.memory_space<vmem>>, %arg3: memref<16x128xf32, #tpu.memory_space<vmem>>, %arg4: memref<16x128xf32, #tpu.memory_space<vmem>>, %arg5: memref<16x128xf32, #tpu.memory_space<vmem>>, %arg6: memref<16x128xf32, #tpu.memory_space<vmem>>, %arg7: memref<16x128xf32, #tpu.memory_space<vmem>>) attributes {dimension_semantics = [#tpu.dimension_semantics<parallel>], iteration_bounds = array<i64: 1>, scalar_prefetch = 0 : i64, scratch_operands = 0 : i64, tpu.core_type = #tpu.core_type<tc>, window_params = [{transform_indices = @transform_0, window_bounds = array<i64: 1>}, {transform_indices = @transform_1, window_bounds = array<i64: 16, 128>}, {transform_indices = @transform_2, window_bounds = array<i64: 16, 128>}, {transform_indices = @transform_3, window_bounds = array<i64: 16, 128>}, {transform_indices = @transform_4, window_bounds = array<i64: 16, 128>}, {transform_indices = @transform_5, window_bounds = array<i64: 16, 128>}, {transform_indices = @transform_6, window_bounds = array<i64: 16, 128>}]} {
    %c0 = arith.constant 0 : index
    %c0_0 = arith.constant 0 : index
    %0 = vector.load %arg2[%c0, %c0_0] : memref<16x128xf32, #tpu.memory_space<vmem>>, vector<16x128xf32>
    %c0_1 = arith.constant 0 : index
    %1 = memref.load %arg1[%c0_1] : memref<1xf32, #tpu.memory_space<smem>>
    %c0_2 = arith.constant 0 : index
    %c0_3 = arith.constant 0 : index
    %2 = vector.load %arg3[%c0_2, %c0_3] : memref<16x128xf32, #tpu.memory_space<vmem>>, vector<16x128xf32>
    %cst = arith.constant 9.990000e-01 : f32
    %3 = vector.broadcast %cst : f32 to vector<16x128xf32>
    %4 = arith.mulf %2, %3 : vector<16x128xf32>
    %cst_4 = arith.constant 9.99999996E-13 : f32
    %5 = vector.broadcast %cst_4 : f32 to vector<16x128xf32>
    %6 = arith.addf %4, %5 : vector<16x128xf32>
    %7 = math.log %6 : vector<16x128xf32>
    %cst_5 = arith.constant 0.000000e+00 : f32
    %8 = vector.broadcast %cst_5 : f32 to vector<16x128xf32>
    %9 = arith.subf %8, %7 : vector<16x128xf32>
    %10 = math.log %9 : vector<16x128xf32>
    %cst_6 = arith.constant 0.000000e+00 : f32
    %11 = vector.broadcast %cst_6 : f32 to vector<16x128xf32>
    %12 = arith.subf %11, %10 : vector<16x128xf32>
    %13 = arith.addf %0, %12 : vector<16x128xf32>
    %14 = vector.broadcast %1 : f32 to vector<16x128xf32>
    %15 = arith.divf %13, %14 : vector<16x128xf32>
    %cst_7 = arith.constant dense<0xFF800000> : vector<16xf32>
    %16 = vector.multi_reduction <maximumf>, %15, %cst_7 [1] : vector<16x128xf32> to vector<16xf32>
    %17 = vector.shape_cast %16 : vector<16xf32> to vector<16x1xf32>
    %18 = vector.broadcast %17 : vector<16x1xf32> to vector<16x128xf32>
    %19 = arith.subf %15, %18 : vector<16x128xf32>
    %20 = math.exp %19 : vector<16x128xf32>
    %cst_8 = arith.constant dense<0.000000e+00> : vector<16xf32>
    %21 = vector.multi_reduction <add>, %20, %cst_8 [1] : vector<16x128xf32> to vector<16xf32>
    %22 = vector.shape_cast %21 : vector<16xf32> to vector<16x1xf32>
    %23 = vector.broadcast %22 : vector<16x1xf32> to vector<16x128xf32>
    %24 = arith.divf %20, %23 : vector<16x128xf32>
    %c0_9 = arith.constant 0 : index
    %c0_10 = arith.constant 0 : index
    %25 = vector.load %arg4[%c0_9, %c0_10] : memref<16x128xf32, #tpu.memory_space<vmem>>, vector<16x128xf32>
    %cst_11 = arith.constant 9.990000e-01 : f32
    %26 = vector.broadcast %cst_11 : f32 to vector<16x128xf32>
    %27 = arith.mulf %25, %26 : vector<16x128xf32>
    %cst_12 = arith.constant 9.99999996E-13 : f32
    %28 = vector.broadcast %cst_12 : f32 to vector<16x128xf32>
    %29 = arith.addf %27, %28 : vector<16x128xf32>
    %30 = math.log %29 : vector<16x128xf32>
    %cst_13 = arith.constant 0.000000e+00 : f32
    %31 = vector.broadcast %cst_13 : f32 to vector<16x128xf32>
    %32 = arith.subf %31, %30 : vector<16x128xf32>
    %33 = math.log %32 : vector<16x128xf32>
    %cst_14 = arith.constant 0.000000e+00 : f32
    %34 = vector.broadcast %cst_14 : f32 to vector<16x128xf32>
    %35 = arith.subf %34, %33 : vector<16x128xf32>
    %36 = arith.addf %15, %35 : vector<16x128xf32>
    %cst_15 = arith.constant dense<0xFF800000> : vector<16xf32>
    %37 = vector.multi_reduction <maximumf>, %36, %cst_15 [1] : vector<16x128xf32> to vector<16xf32>
    %38 = vector.shape_cast %37 : vector<16xf32> to vector<16x1xf32>
    %39 = tpu.iota {dimensions = array<i32: 1>} : vector<16x128xi32>
    %40 = vector.broadcast %38 : vector<16x1xf32> to vector<16x128xf32>
    %41 = arith.cmpf oeq, %36, %40 : vector<16x128xf32>
    %c128_i32 = arith.constant 128 : i32
    %42 = vector.broadcast %c128_i32 : i32 to vector<16x128xi32>
    %43 = arith.select %41, %39, %42 : vector<16x128xi1>, vector<16x128xi32>
    %cst_16 = arith.constant dense<2147483647> : vector<16xi32>
    %44 = vector.multi_reduction <minsi>, %43, %cst_16 [1] : vector<16x128xi32> to vector<16xi32>
    %45 = vector.shape_cast %44 : vector<16xi32> to vector<16x1xi32>
    %46 = vector.broadcast %45 : vector<16x1xi32> to vector<16x128xi32>
    %47 = arith.cmpi eq, %39, %46 : vector<16x128xi32>
    %48 = arith.extui %47 : vector<16x128xi1> to vector<16x128xi32>
    %49 = arith.sitofp %48 : vector<16x128xi32> to vector<16x128xf32>
    %50 = arith.subf %49, %24 : vector<16x128xf32>
    %51 = arith.addf %50, %24 : vector<16x128xf32>
    %52 = arith.mulf %51, %49 : vector<16x128xf32>
    %cst_17 = arith.constant dense<0.000000e+00> : vector<16xf32>
    %53 = vector.multi_reduction <add>, %52, %cst_17 [1] : vector<16x128xf32> to vector<16xf32>
    %54 = vector.shape_cast %53 : vector<16xf32> to vector<16x1xf32>
    %55 = arith.sitofp %45 : vector<16x1xi32> to vector<16x1xf32>
    %56 = arith.subf %55, %54 : vector<16x1xf32>
    %57 = arith.addf %56, %54 : vector<16x1xf32>
    %58 = vector.shape_cast %57 : vector<16x1xf32> to vector<16x1xf32>
    %59 = vector.broadcast %58 : vector<16x1xf32> to vector<16x128xf32>
    %c0_18 = arith.constant 0 : index
    %c0_19 = arith.constant 0 : index
    %60 = vector.load %arg5[%c0_18, %c0_19] : memref<16x128xf32, #tpu.memory_space<vmem>>, vector<16x128xf32>
    tpu.vector_store %arg5[%c0_18, %c0_19], %59 {strides = array<i32>} : memref<16x128xf32, #tpu.memory_space<vmem>>, vector<16x128xf32>,
    %c0_20 = arith.constant 0 : index
    %c0_21 = arith.constant 0 : index
    %61 = vector.load %arg6[%c0_20, %c0_21] : memref<16x128xf32, #tpu.memory_space<vmem>>, vector<16x128xf32>
    tpu.vector_store %arg6[%c0_20, %c0_21], %51 {strides = array<i32>} : memref<16x128xf32, #tpu.memory_space<vmem>>, vector<16x128xf32>,
    %c0_22 = arith.constant 0 : index
    %c0_23 = arith.constant 0 : index
    %62 = vector.load %arg7[%c0_22, %c0_23] : memref<16x128xf32, #tpu.memory_space<vmem>>, vector<16x128xf32>
    tpu.vector_store %arg7[%c0_22, %c0_23], %24 {strides = array<i32>} : memref<16x128xf32, #tpu.memory_space<vmem>>, vector<16x128xf32>,
    return
  }
  func.func @transform_0(%arg0: i32) -> i32 {
    %c0_i32 = arith.constant 0 : i32
    %c0_i32_0 = arith.constant 0 : i32
    return %c0_i32 : i32
  }
  func.func @transform_1(%arg0: i32) -> (i32, i32) {
    %c0_i32 = arith.constant 0 : i32
    %c0_i32_0 = arith.constant 0 : i32
    return %arg0, %c0_i32 : i32, i32
  }
  func.func @transform_2(%arg0: i32) -> (i32, i32) {
    %c0_i32 = arith.constant 0 : i32
    %c0_i32_0 = arith.constant 0 : i32
    return %arg0, %c0_i32 : i32, i32
  }
  func.func @transform_3(%arg0: i32) -> (i32, i32) {
    %c0_i32 = arith.constant 0 : i32
    %c0_i32_0 = arith.constant 0 : i32
    return %arg0, %c0_i32 : i32, i32
  }
  func.func @transform_4(%arg0: i32) -> (i32, i32) {
    %c0_i32 = arith.constant 0 : i32
    %c0_i32_0 = arith.constant 0 : i32
    return %arg0, %c0_i32 : i32, i32
  }
  func.func @transform_5(%arg0: i32) -> (i32, i32) {
    %c0_i32 = arith.constant 0 : i32
    %c0_i32_0 = arith.constant 0 : i32
    return %arg0, %c0_i32 : i32, i32
  }
  func.func @transform_6(%arg0: i32) -> (i32, i32) {
    %c0_i32 = arith.constant 0 : i32
    %c0_i32_0 = arith.constant 0 : i32
    return %arg0, %c0_i32 : i32, i32
  }
}

</mosaic_0001>

<bundles_post_ra>
// kernel: tpu_custom_call.1
= control target key start
LH: loop header
LB: loop body
LE: loop exit
PB: predicated region body
PF: predicated region fallthrough
CT: control target
= control target key end

     0   :  { %13 = vsyncpa [#allocation4], 0  ;;  %s498_s0 = inlined_call_operand.<no memory space> [shape: f32[1], index: 0, kind: input, shape index: {}]   ;;  %s499_s1 = inlined_call_operand.hbm [shape: f32[16,128], index: 1, kind: input, shape index: {}]   ;;  %s500_s2 = inlined_call_operand.hbm [shape: f32[16,128], index: 2, kind: input, shape index: {}]   ;;  %s501_s3 = inlined_call_operand.hbm [shape: f32[16,128], index: 3, kind: input, shape index: {}]   ;;  %s502_s4 = inlined_call_operand.hbm [shape: f32[16,128], index: 4, kind: output, shape index: {0}]   ;;  %s503_s5 = inlined_call_operand.hbm [shape: f32[16,128], index: 5, kind: output, shape index: {1}]   ;;  %s504_s6 = inlined_call_operand.hbm [shape: f32[16,128], index: 6, kind: output, shape index: {2}]  }
   0x1   :  { %14 = vsyncpa [#allocation7], 0 }
   0x2   :  { %15 = vsyncpa [#allocation5], 0 }
   0x3   :  { %16 = vsyncpa [#allocation11], 0  ;;  %s409_s21 = smov [#allocation6]   ;;  %s410_s23 = smov [#allocation3]  }
   0x4   :  { %s36_s22 = sshll.u32 %s409_s21, 4  ;;  %s24_s24 = sshll.u32 %s410_s23, 4  ;;  %s37_s22 = int_to_ptr.vmem [resolvable:$true] %s36_s22  ;;  %s25_s24 = int_to_ptr.vmem [resolvable:$true] %s24_s24 }
   0x5   :  { %s289_s25 = scalar_lea.vmem %s37_s22, 256  ;;  %p294_p1 = scmp.lt.s32.totalorder %s37_s22, %s37_s22 }
   0x6   :  { %p290_p0 = scmp.ne.s32.totalorder %s37_s22, %s289_s25  ;;  %p295_p2 = scmp.lt.s32.totalorder %s289_s25, %s289_s25 }
   0x8   :  { %p296_p3 = por %p295_p2, %p294_p1 }
   0xa   :  { %p297_p4 = pnand %p296_p3, %p290_p0 }
   0xc   :  { %300 = shalt.err (!%p297_p4)
}
   0xd   :  { %s411_s26 = smov 128   ;;  %s412_s27 = smov 8  }
   0xe   :  { %42 = dma.hbm_to_vmem [thread:$0]  %s500_s2, 256, %s37_s22, [#allocation7], %s411_s26, %s411_s26, %s412_s27  }
   0xf   :  { %s309_s30 = scalar_lea.vmem %s25_s24, 256  ;;  %p314_p6 = scmp.lt.s32.totalorder %s25_s24, %s25_s24 }
  0x10   :  { %p310_p5 = scmp.ne.s32.totalorder %s25_s24, %s309_s30  ;;  %p315_p7 = scmp.lt.s32.totalorder %s309_s30, %s309_s30 }
  0x12   :  { %p316_p8 = por %p315_p7, %p314_p6 }
  0x14   :  { %p317_p9 = pnand %p316_p8, %p310_p5 }
  0x16   :  { %320 = shalt.err (!%p317_p9)
}
  0x17   :  { %30 = dma.hbm_to_vmem [thread:$0]  %s499_s1, 256, %s25_s24, [#allocation4], %s411_s26, %s411_s26, %s412_s27  }
  0x18   :  { %s413_s9 = smov [#allocation8]  }
  0x19   :  { %s48_s10 = sshll.u32 %s413_s9, 4  ;;  %s49_s10 = int_to_ptr.vmem [resolvable:$true] %s48_s10 }
  0x1a   :  { %s329_s11 = scalar_lea.vmem %s49_s10, 256  ;;  %p334_p11 = scmp.lt.s32.totalorder %s49_s10, %s49_s10 }
  0x1b   :  { %p330_p10 = scmp.ne.s32.totalorder %s49_s10, %s329_s11  ;;  %p335_p12 = scmp.lt.s32.totalorder %s329_s11, %s329_s11 }
  0x1d   :  { %p336_p13 = por %p335_p12, %p334_p11 }
  0x1f   :  { %p337_p0 = pnand %p336_p13, %p330_p10 }
  0x21   :  { %340 = shalt.err (!%p337_p0)
}
  0x22   :  { %54 = dma.hbm_to_vmem [thread:$0]  %s501_s3, 256, %s49_s10, [#allocation7], %s411_s26, %s411_s26, %s412_s27  }
  0x23   :  { %401 = dma.done.wait [#allocation4], 256  }
  0x24   :  { %402 = vsyncadd [#allocation4], 4294967040 }
  0x25   :  { %403 = dma.done.wait [#allocation7], 512  }
  0x26   :  { %404 = vsyncadd [#allocation7], 4294966784  ;;  %v67_v0 = vld [vmem:[#allocation6] sm:$0xff]  ;;  %v109_v1 = vld [vmem:[#allocation8] sm:$0xff]  ;;  %v87_v23 = vstv %s498_s0  ;;  %v133_v46 = vlaneseq  ;;  %s415_s0 = smov [#allocation10]  }
  0x27   :  { %v69_v2 = vmul.f32 0.999, %v67_v0  ;;  %v111_v3 = vmul.f32 0.999, %v109_v1  ;;  %v68_v4 = vld [vmem:[#allocation6 + $0x8] sm:$0xff]  ;;  %v110_v6 = vld [vmem:[#allocation8 + $0x8] sm:$0xff] }
  0x28   :  { %v70_v5 = vmul.f32 0.999, %v68_v4  ;;  %v112_v9 = vmul.f32 0.999, %v110_v6  ;;  %v64_v29 = vld [vmem:[#allocation3] sm:$0xff]  ;;  %v65_v35 = vld [vmem:[#allocation3 + $0x8] sm:$0xff] }
  0x29   :  { %v71_v7 = vadd.f32 1e-12, %v69_v2  ;;  %v113_v8 = vadd.f32 1e-12, %v111_v3  ;;  %v474_v48 = vand.u32 127, %v133_v46  ;;  %s212_s13 = sshll.u32 %s415_s0, 4  ;;  %s213_s13 = int_to_ptr.vmem [resolvable:$true] %s212_s13 }
  0x2a   :  { %v72_v10 = vadd.f32 1e-12, %v70_v5  ;;  %v114_v11 = vadd.f32 1e-12, %v112_v9  ;;  %s341_s14 = scalar_lea.vmem %s213_s13, 256  ;;  %p346_p2 = scmp.lt.s32.totalorder %s213_s13, %s213_s13 }
  0x2b   :  { %255 = vlog2.f32 %v71_v7  ;;  %p342_p1 = scmp.ne.s32.totalorder %s213_s13, %s341_s14  ;;  %p347_p3 = scmp.lt.s32.totalorder %s341_s14, %s341_s14 }
  0x2c   :  { %257 = vlog2.f32 %v113_v8 }
  0x2d   :  { %259 = vlog2.f32 %v72_v10  ;;  %p348_p4 = por %p347_p3, %p346_p2 }
  0x2e   :  { %261 = vlog2.f32 %v114_v11 }
  0x2f   :  { %p349_p5 = pnand %p348_p4, %p342_p1 }
  0x38   :  { %v256_v12 = vpop.eup %255 }
  0x39   :  { %v258_v13 = vpop.eup %257  ;;  %v74_v14 = vmul.f32 0.6931472, %v256_v12 }
  0x3a   :  { %v260_v15 = vpop.eup %259  ;;  %v116_v16 = vmul.f32 0.6931472, %v258_v13 }
  0x3b   :  { %v262_v17 = vpop.eup %261  ;;  %v77_v18 = vsub.f32 0.0, %v74_v14  ;;  %v76_v19 = vmul.f32 0.6931472, %v260_v15 }
  0x3c   :  { %v119_v20 = vsub.f32 0.0, %v116_v16  ;;  %v118_v21 = vmul.f32 0.6931472, %v262_v17 }
  0x3d   :  { %263 = vlog2.f32 %v77_v18  ;;  %v78_v22 = vsub.f32 0.0, %v76_v19 }
  0x3e   :  { %265 = vlog2.f32 %v119_v20  ;;  %v120_v24 = vsub.f32 0.0, %v118_v21 }
  0x3f   :  { %267 = vlog2.f32 %v78_v22 }
  0x40   :  { %269 = vlog2.f32 %v120_v24 }
  0x41   :  { %271 = vrcp.f32 %v87_v23  ;;  %v414_v23 = vmov 0.0  }
  0x4a   :  { %v264_v25 = vpop.eup %263 }
  0x4b   :  { %v266_v26 = vpop.eup %265  ;;  %v80_v27 = vmul.f32 0.6931472, %v264_v25 }
  0x4c   :  { %v268_v28 = vpop.eup %267  ;;  %v122_v30 = vmul.f32 0.6931472, %v266_v26 }
  0x4d   :  { %v270_v31 = vpop.eup %269  ;;  %v83_v32 = vsub.f32 0.0, %v80_v27  ;;  %v82_v33 = vmul.f32 0.6931472, %v268_v28 }
  0x4e   :  { %v272_v34 = vpop.eup %271  ;;  %v124_v36 = vmul.f32 0.6931472, %v270_v31  ;;  %v125_v38 = vsub.f32 0.0, %v122_v30 }
  0x4f   :  { %v85_v37 = vadd.f32 %v83_v32, %v64_v29  ;;  %v84_v39 = vsub.f32 0.0, %v82_v33 }
  0x50   :  { %v126_v42 = vsub.f32 0.0, %v124_v36 }
  0x51   :  { %v89_v40 = vmul.f32 %v272_v34, %v85_v37  ;;  %v86_v41 = vadd.f32 %v84_v39, %v65_v35 }
  0x53   :  { %91 = vmax.xlane.f32.xlu1 %v89_v40  ;;  %v127_v43 = vadd.f32 %v125_v38, %v89_v40  ;;  %v90_v44 = vmul.f32 %v272_v34, %v86_v41 }
  0x55   :  { %129 = vmax.xlane.f32.xlu0 %v127_v43  ;;  %v128_v45 = vadd.f32 %v126_v42, %v90_v44 }
  0x57   :  { %93 = vmax.xlane.f32.xlu1 %v90_v44 }
  0x59   :  { %131 = vmax.xlane.f32.xlu0 %v128_v45 }
  0xdc   :  { %v92_v47 = vpop.xlane.xlu1 %91 }
  0xdd   :  { %v95_v49 = vsub.f32 %v89_v40, %v92_v47 }
  0xde   :  { %v130_v50 = vpop.xlane.xlu0 %129 }
  0xdf   :  { %v97_v51 = vmul.f32 1.442695, %v95_v49  ;;  %vm135_vm0 = vcmp.eq.f32.partialorder %v127_v43, %v130_v50 }
  0xe0   :  { %v137_v52 = vsel %vm135_vm0, %v474_v48, 128  ;;  %v94_v53 = vpop.xlane.xlu1 %93 }
  0xe1   :  { %273 = vpow2.f32 %v97_v51  ;;  %v96_v54 = vsub.f32 %v90_v44, %v94_v53  ;;  %v140_v55 = vshra.s32 %v137_v52, 16  ;;  %v139_v0 = vand.u32 65535, %v137_v52 }
  0xe2   :  { %v132_v56 = vpop.xlane.xlu0 %131 }
  0xe3   :  { %v99_v57 = vmul.f32 1.442695, %v96_v54  ;;  %vm136_vm1 = vcmp.eq.f32.partialorder %v128_v45, %v132_v56  ;;  %v142_v58 = vcvt.s32.f32 %v140_v55  ;;  %v141_v3 = vcvt.s32.f32 %v139_v0 }
  0xe4   :  { %v138_v59 = vsel %vm136_vm1, %v474_v48, 128 }
  0xe5   :  { %275 = vpow2.f32 %v99_v57  ;;  %143 = vmin.xlane.f32.xlu0 %v142_v58  ;;  %v154_v60 = vshra.s32 %v138_v59, 16  ;;  %v153_v1 = vand.u32 65535, %v138_v59 }
  0xe7   :  { %v156_v61 = vcvt.s32.f32 %v154_v60  ;;  %v155_v6 = vcvt.s32.f32 %v153_v1 }
  0xe9   :  { %157 = vmin.xlane.f32.xlu1 %v156_v61 }
  0xee   :  { %v274_v62 = vpop.eup %273 }
  0xef   :  { %101 = vadd.xlane.f32.xlu0 %v274_v62 }
  0xf2   :  { %v276_v63 = vpop.eup %275 }
  0xf3   :  { %103 = vadd.xlane.f32.xlu1 %v276_v63 }
 0x16e   :  { %v144_v2 = vpop.xlane.xlu0 %143 }
 0x16f   :  { %vm145_vm2 = vcmp.eq.f32.partialorder %v142_v58, %v144_v2  ;;  %v150_v14 = vcvt.f32.s32 %v144_v2 }
 0x170   :  { %v146_v4 = vsel %vm145_vm2, %v141_v3, inf }
 0x171   :  { %147 = vmin.xlane.f32.xlu0 %v146_v4  ;;  %v151_v16 = vshll.u32 %v150_v14, 16 }
 0x172   :  { %v158_v5 = vpop.xlane.xlu1 %157 }
 0x173   :  { %vm159_vm3 = vcmp.eq.f32.partialorder %v156_v61, %v158_v5  ;;  %v164_v17 = vcvt.f32.s32 %v158_v5 }
 0x174   :  { %v160_v7 = vsel %vm159_vm3, %v155_v6, inf }
 0x175   :  { %161 = vmin.xlane.f32.xlu1 %v160_v7  ;;  %v165_v21 = vshll.u32 %v164_v17, 16 }
 0x178   :  { %v102_v8 = vpop.xlane.xlu0 %101 }
 0x179   :  { %277 = vrcp.f32 %v102_v8 }
 0x17c   :  { %v104_v9 = vpop.xlane.xlu1 %103 }
 0x17d   :  { %279 = vrcp.f32 %v104_v9 }
 0x186   :  { %v278_v10 = vpop.eup %277 }
 0x187   :  { %v106_v11 = vmul.f32 %v278_v10, %v274_v62 }
 0x189   :  { %193 = vst [vmem:[#allocation12] sm:$0xff] %v106_v11 }
 0x18a   :  { %v280_v12 = vpop.eup %279 }
 0x18b   :  { %v108_v13 = vmul.f32 %v280_v12, %v276_v63 }
 0x18d   :  { %194 = vst [vmem:[#allocation12 + $0x8] sm:$0xff] %v108_v13 }
 0x1fa   :  { %v148_v15 = vpop.xlane.xlu0 %147 }
 0x1fb   :  { %v149_v18 = vcvt.f32.s32 %v148_v15 }
 0x1fd   :  { %v152_v19 = vadd.s32 %v151_v16, %v149_v18 }
 0x1fe   :  { %v162_v20 = vpop.xlane.xlu1 %161 }
 0x1ff   :  { %v163_v22 = vcvt.f32.s32 %v162_v20  ;;  %vm167_vm4 = vcmp.eq.s32.totalorder %v474_v48, %v152_v19 }
 0x200   :  { %v244_v24 = vsel %vm167_vm4, 1.0, %v414_v23 }
 0x201   :  { %v166_v25 = vadd.s32 %v165_v21, %v163_v22  ;;  %v173_v26 = vsub.f32 %v244_v24, %v106_v11 }
 0x203   :  { %v175_v27 = vadd.f32 %v173_v26, %v106_v11  ;;  %vm168_vm5 = vcmp.eq.s32.totalorder %v474_v48, %v166_v25 }
 0x204   :  { %v245_v28 = vsel %vm168_vm5, 1.0, %v414_v23 }
 0x205   :  { %v177_v29 = vmul.f32 %v244_v24, %v175_v27  ;;  %191 = vst [vmem:[#allocation10] sm:$0xff] %v175_v27  ;;  %v174_v30 = vsub.f32 %v245_v28, %v108_v13 }
 0x207   :  { %179 = vadd.xlane.f32.xlu0 %v177_v29  ;;  %v176_v31 = vadd.f32 %v174_v30, %v108_v13 }
 0x209   :  { %v178_v32 = vmul.f32 %v245_v28, %v176_v31  ;;  %192 = vst [vmem:[#allocation10 + $0x8] sm:$0xff] %v176_v31 }
 0x20b   :  { %181 = vadd.xlane.f32.xlu1 %v178_v32 }
 0x20c   :  { %352 = shalt.err (!%p349_p5)
}
 0x20d   :  { %218 = dma.vmem_to_hbm [thread:$0]  %s213_s13, 256, %s503_s5, [#allocation11], %s411_s26, %s411_s26, %s412_s27  }
 0x20e   :  { %s416_s17 = smov [#allocation12]  }
 0x20f   :  { %s224_s18 = sshll.u32 %s416_s17, 4  ;;  %s225_s18 = int_to_ptr.vmem [resolvable:$true] %s224_s18 }
 0x210   :  { %s361_s19 = scalar_lea.vmem %s225_s18, 256  ;;  %p366_p7 = scmp.lt.s32.totalorder %s225_s18, %s225_s18 }
 0x211   :  { %p362_p6 = scmp.ne.s32.totalorder %s225_s18, %s361_s19  ;;  %p367_p8 = scmp.lt.s32.totalorder %s361_s19, %s361_s19 }
 0x213   :  { %p368_p9 = por %p367_p8, %p366_p7 }
 0x215   :  { %p369_p10 = pnand %p368_p9, %p362_p6 }
 0x217   :  { %372 = shalt.err (!%p369_p10)
}
 0x218   :  { %230 = dma.vmem_to_hbm [thread:$0]  %s225_s18, 256, %s504_s6, [#allocation11], %s411_s26, %s411_s26, %s412_s27   ;;  %v183_v33 = vcvt.s32.f32 %v152_v19  ;;  %v184_v37 = vcvt.s32.f32 %v166_v25 }
 0x219   :  { %s417_s5 = smov [#allocation9]  }
 0x21a   :  { %s200_s22 = sshll.u32 %s417_s5, 4  ;;  %s201_s22 = int_to_ptr.vmem [resolvable:$true] %s200_s22 }
 0x21b   :  { %s381_s23 = scalar_lea.vmem %s201_s22, 256  ;;  %p386_p12 = scmp.lt.s32.totalorder %s201_s22, %s201_s22 }
 0x21c   :  { %p382_p11 = scmp.ne.s32.totalorder %s201_s22, %s381_s23  ;;  %p387_p13 = scmp.lt.s32.totalorder %s381_s23, %s381_s23 }
 0x21e   :  { %p388_p0 = por %p387_p13, %p386_p12 }
 0x220   :  { %p389_p1 = pnand %p388_p0, %p382_p11 }
 0x290   :  { %v180_v34 = vpop.xlane.xlu0 %179 }
 0x291   :  { %v185_v35 = vsub.f32 %v183_v33, %v180_v34 }
 0x293   :  { %v187_v36 = vadd.f32 %v185_v35, %v180_v34 }
 0x294   :  { %v182_v38 = vpop.xlane.xlu1 %181 }
 0x295   :  { %189 = vst [vmem:[#allocation9] sm:$0xff] %v187_v36  ;;  %v186_v39 = vsub.f32 %v184_v37, %v182_v38 }
 0x297   :  { %v188_v40 = vadd.f32 %v186_v39, %v182_v38 }
 0x299   :  { %190 = vst [vmem:[#allocation9 + $0x8] sm:$0xff] %v188_v40 }
 0x29a   :  { %392 = shalt.err (!%p389_p1)
}
 0x29b   :  { %206 = dma.vmem_to_hbm [thread:$0]  %s201_s22, 256, %s502_s4, [#allocation5], %s411_s26, %s411_s26, %s412_s27  }
 0x29c   :  { %405 = dma.done.wait [#allocation5], 256  }
 0x29d   :  { %406 = vsyncadd [#allocation5], 4294967040 }
 0x29e   :  { %407 = dma.done.wait [#allocation11], 512  }
 0x29f   :  { %408 = vsyncadd [#allocation11], 4294966784 }
 0x2a0   :  { %240 = vsyncpa [#allocation4], 1 }
 0x2a1   :  { %241 = vsyncpa [#allocation7], 1 }
 0x2a2   :  { %242 = vsyncpa [#allocation5], 1 }
 0x2a3   :  { %243 = vsyncpa [#allocation11], 1 }

</bundles_post_ra>
